<compile_context>
chip_gen: v7x
topology: tpu7x:2x2x1
jax: 0.10.0
libtpu: 0.0.40
codegen_flags: <defaults>
</compile_context>

<pallas_src>
import math

import jax
import jax.numpy as jnp
from jax.experimental import pallas as pl
from jax.experimental.pallas import tpu as pltpu


def _round_up(x: int, m: int) -> int:
    return ((x + m - 1) // m) * m


def _gelu_tanh(x):
    # TODO(synk): PyTorch nn.GELU() defaults to the exact erf form; the tanh
    # approximation is used for guaranteed Mosaic/EUP lowering (|diff| ~1e-3).
    c = math.sqrt(2.0 / math.pi)
    return 0.5 * x * (1.0 + jnp.tanh(c * (x + 0.044715 * x * x * x)))


def _mlp_kernel(x_ref, w1_ref, b1_ref, w2_ref, b2_ref, o_ref):
    # x_ref:  (TM, E)  token tile (input dtype, e.g. f32)
    # w1_ref: (E, H)   fc1 weight, bf16, VMEM-resident
    # b1_ref: (1, H)   f32
    # w2_ref: (H, E)   fc2 weight, bf16, VMEM-resident
    # b2_ref: (1, E)   f32
    # o_ref:  (TM, E)
    xb = x_ref[...].astype(w1_ref.dtype)                       # bf16 MXU operand
    h = jnp.dot(xb, w1_ref[...], preferred_element_type=jnp.float32)
    h = h + b1_ref[...]                                        # bias add in f32
    h = _gelu_tanh(h)                                          # GELU in f32
    # TODO(synk): dropout is the eval/inference identity here; a PRNG-masked
    # path (pltpu.prng_seed / prng_random_bits) is needed for training mode.
    hb = h.astype(w2_ref.dtype)                                # explicit mixed-precision downcast
    out = jnp.dot(hb, w2_ref[...], preferred_element_type=jnp.float32)
    out = out + b2_ref[...]
    o_ref[...] = out.astype(o_ref.dtype)


def prepare_mlp_params(fc1_w, fc1_b, fc2_w, fc2_b, compute_dtype=jnp.bfloat16):
    """One-time parameter prep (outside the per-forward path).

    fc1_w: (H, E) PyTorch Linear layout -> (E, H) compute_dtype
    fc2_w: (E, H)                        -> (H, E) compute_dtype
    Biases stay f32 (added in the f32 accumulator).
    """
    w1 = jnp.asarray(fc1_w, dtype=compute_dtype).T          # (E, H)
    w2 = jnp.asarray(fc2_w, dtype=compute_dtype).T          # (H, E)
    b1 = jnp.asarray(fc1_b, dtype=jnp.float32).reshape(1, -1)
    b2 = jnp.asarray(fc2_b, dtype=jnp.float32).reshape(1, -1)
    return w1, b1, w2, b2


def _pick_token_tile(m_aligned: int, token_tile: int) -> int:
    """Pick a sublane-aligned tile that divides the token count when possible
    (avoids padding / copying the activation)."""
    token_tile = max(8, (token_tile // 8) * 8)
    if m_aligned <= token_tile:
        return m_aligned
    if m_aligned % token_tile == 0:
        return token_tile
    cand = token_tile
    floor = max(8, token_tile // 2)
    while cand >= floor:
        if m_aligned % cand == 0:
            return cand
        cand -= 8
    return token_tile  # no good divisor: pad only the tail tile


def _vmem_limit_bytes(tm: int, E: int, H: int, x_itemsize: int, w_itemsize: int) -> int:
    weights = 2 * E * H * w_itemsize + (E + H) * 4          # single-buffered residents
    io = 2 * 2 * tm * E * x_itemsize                        # double-buffered in + out tiles
    interm = 2 * tm * H * 4 + tm * E * 4                    # f32 h / GELU / acc headroom
    need = weights + io + interm + (4 << 20)                # scheduling margin
    try:
        cap = pltpu.get_tpu_info().vmem_capacity_bytes
    except Exception:
        cap = 64 << 20                                      # v7x per-TC floor
    return int(min(max(need, 16 << 20), int(cap * 0.9)))


def mlp_forward(x, params, *, token_tile=512):
    """Fused ViT MLP forward.

    x:      (N, S, E) activations
    params: output of prepare_mlp_params (bf16 (E,H)/(H,E) weights, f32 biases)
    Returns (N, S, E) in x.dtype.
    """
    w1, b1, w2, b2 = params
    N, S, E = x.shape
    Ew, H = w1.shape
    assert Ew == E and w2.shape == (H, E)
    assert b1.shape == (1, H) and b2.shape == (1, E)

    M = N * S
    x2 = x.reshape(M, E)

    m_aligned = _round_up(M, 8)
    tm = _pick_token_tile(m_aligned, token_tile)
    m_padded = _round_up(m_aligned, tm)
    if m_padded != M:
        # Only reached when no divisor-tile exists or M isn't 8-aligned; pads
        # at most tm-1 tail rows.
        x2 = jnp.pad(x2, ((0, m_padded - M), (0, 0)))

    grid = (m_padded // tm,)
    resident = pl.Buffered(1)  # constant index_map -> single-buffer the weights

    # TODO(synk): for ViT-L/H sizes where 2*E*H*2B of bf16 weights (> ~24 MiB)
    # strains v7x's 64 MiB VMEM, add an 'arbitrary' H grid axis that slices w1
    # columns / w2 rows and accumulates fc2 into a (tm, E) f32 scratch with
    # pl.when init/finalize.
    out = pl.pallas_call(
        _mlp_kernel,
        out_shape=jax.ShapeDtypeStruct((m_padded, E), x.dtype),
        grid_spec=pltpu.PrefetchScalarGridSpec(
            num_scalar_prefetch=0,
            grid=grid,
            in_specs=[
                pl.BlockSpec((tm, E), lambda i: (i, 0)),                            # token tile
                pl.BlockSpec((E, H), lambda i: (0, 0), pipeline_mode=resident),     # fc1 weight
                pl.BlockSpec((1, H), lambda i: (0, 0), pipeline_mode=resident),     # fc1 bias
                pl.BlockSpec((H, E), lambda i: (0, 0), pipeline_mode=resident),     # fc2 weight
                pl.BlockSpec((1, E), lambda i: (0, 0), pipeline_mode=resident),     # fc2 bias
            ],
            out_specs=pl.BlockSpec((tm, E), lambda i: (i, 0)),
        ),
        compiler_params=pltpu.CompilerParams(
            dimension_semantics=("parallel",),
            vmem_limit_bytes=_vmem_limit_bytes(
                tm, E, H, x.dtype.itemsize, w1.dtype.itemsize),
        ),
    )(x2, w1, b1, w2, b2)

    return out[:M].reshape(N, S, E)


def _reference(x, fc1_w, fc1_b, fc2_w, fc2_b):
    h = jnp.einsum("nse,he->nsh", x, fc1_w) + fc1_b
    h = _gelu_tanh(h)
    return jnp.einsum("nsh,eh->nse", h, fc2_w) + fc2_b


if __name__ == "__main__":
    # Small MLP config consistent with the module (embed_dim, mlp_hidden_size),
    # lane-aligned (E, H multiples of 128).
    batch = 2
    seq = 8
    embed_dim = 128
    mlp_hidden = 256

    key = jax.random.PRNGKey(0)
    k_x, k_w1, k_b1, k_w2, k_b2 = jax.random.split(key, 5)

    x = jax.random.normal(k_x, (batch, seq, embed_dim), dtype=jnp.float32)
    fc1_w = jax.random.normal(k_w1, (mlp_hidden, embed_dim), jnp.float32) * 0.02
    fc1_b = jax.random.normal(k_b1, (mlp_hidden,), jnp.float32) * 0.02
    fc2_w = jax.random.normal(k_w2, (embed_dim, mlp_hidden), jnp.float32) * 0.02
    fc2_b = jax.random.normal(k_b2, (embed_dim,), jnp.float32) * 0.02

    params = prepare_mlp_params(fc1_w, fc1_b, fc2_w, fc2_b)   # one-time prep (transpose + bf16)
    out = jax.block_until_ready(mlp_forward(x, params))

    ref = _reference(x, fc1_w, fc1_b, fc2_w, fc2_b)
    assert out.shape == (batch, seq, embed_dim), out.shape
    # bf16 MXU operands vs f32 reference: tolerance covers the mixed-precision gap.
    max_err = float(jnp.max(jnp.abs(out - ref)))
    assert jnp.allclose(out, ref, atol=2e-2, rtol=2e-2), f"mismatch vs reference (max abs err {max_err})"

    print("KERNEL_OK")
</pallas_src>

<mosaic_0001>
module attributes {stable_mosaic.version = 11 : i64} {
  func.func @_mlp_kernel(%arg0: i32, %arg1: memref<16x128xf32, #tpu.memory_space<vmem>>, %arg2: memref<128x256xbf16, #tpu.memory_space<vmem>>, %arg3: memref<1x256xf32, #tpu.memory_space<vmem>>, %arg4: memref<256x128xbf16, #tpu.memory_space<vmem>>, %arg5: memref<1x128xf32, #tpu.memory_space<vmem>>, %arg6: memref<16x128xf32, #tpu.memory_space<vmem>>) attributes {dimension_semantics = [#tpu.dimension_semantics<parallel>], iteration_bounds = array<i64: 1>, scalar_prefetch = 0 : i64, scratch_operands = 0 : i64, tpu.core_type = #tpu.core_type<tc>, window_params = [{transform_indices = @transform_0, window_bounds = array<i64: 16, 128>}, {pipeline_mode = #tpu.pipeline_mode<synchronous>, transform_indices = @transform_1, window_bounds = array<i64: 128, 256>}, {pipeline_mode = #tpu.pipeline_mode<synchronous>, transform_indices = @transform_2, window_bounds = array<i64: 1, 256>}, {pipeline_mode = #tpu.pipeline_mode<synchronous>, transform_indices = @transform_3, window_bounds = array<i64: 256, 128>}, {pipeline_mode = #tpu.pipeline_mode<synchronous>, transform_indices = @transform_4, window_bounds = array<i64: 1, 128>}, {transform_indices = @transform_5, window_bounds = array<i64: 16, 128>}]} {
    %c0 = arith.constant 0 : index
    %c0_0 = arith.constant 0 : index
    %0 = vector.load %arg1[%c0, %c0_0] : memref<16x128xf32, #tpu.memory_space<vmem>>, vector<16x128xf32>
    %1 = arith.truncf %0 : vector<16x128xf32> to vector<16x128xbf16>
    %c0_1 = arith.constant 0 : index
    %c0_2 = arith.constant 0 : index
    %2 = vector.load %arg2[%c0_1, %c0_2] : memref<128x256xbf16, #tpu.memory_space<vmem>>, vector<128x256xbf16>
    %cst = arith.constant dense<0.000000e+00> : vector<16x256xf32>
    %3 = tpu.matmul %1, %2, %cst {dimension_numbers = #tpu.dot_dimension_numbers<[1], [0], [0], [1], [0, 0, 1, 1], [], []>} : vector<16x128xbf16>, vector<128x256xbf16>, vector<16x256xf32> -> vector<16x256xf32>
    %c0_3 = arith.constant 0 : index
    %c0_4 = arith.constant 0 : index
    %4 = vector.load %arg3[%c0_3, %c0_4] : memref<1x256xf32, #tpu.memory_space<vmem>>, vector<1x256xf32>
    %5 = vector.broadcast %4 : vector<1x256xf32> to vector<16x256xf32>
    %6 = arith.addf %3, %5 : vector<16x256xf32>
    %cst_5 = arith.constant 5.000000e-01 : f32
    %7 = vector.broadcast %cst_5 : f32 to vector<16x256xf32>
    %8 = arith.mulf %7, %6 : vector<16x256xf32>
    %cst_6 = arith.constant 4.471500e-02 : f32
    %9 = vector.broadcast %cst_6 : f32 to vector<16x256xf32>
    %10 = arith.mulf %9, %6 : vector<16x256xf32>
    %11 = arith.mulf %10, %6 : vector<16x256xf32>
    %12 = arith.mulf %11, %6 : vector<16x256xf32>
    %13 = arith.addf %6, %12 : vector<16x256xf32>
    %cst_7 = arith.constant 0.797884583 : f32
    %14 = vector.broadcast %cst_7 : f32 to vector<16x256xf32>
    %15 = arith.mulf %14, %13 : vector<16x256xf32>
    %16 = math.tanh %15 : vector<16x256xf32>
    %cst_8 = arith.constant 1.000000e+00 : f32
    %17 = vector.broadcast %cst_8 : f32 to vector<16x256xf32>
    %18 = arith.addf %17, %16 : vector<16x256xf32>
    %19 = arith.mulf %8, %18 : vector<16x256xf32>
    %20 = arith.truncf %19 : vector<16x256xf32> to vector<16x256xbf16>
    %c0_9 = arith.constant 0 : index
    %c0_10 = arith.constant 0 : index
    %21 = vector.load %arg4[%c0_9, %c0_10] : memref<256x128xbf16, #tpu.memory_space<vmem>>, vector<256x128xbf16>
    %cst_11 = arith.constant dense<0.000000e+00> : vector<16x128xf32>
    %22 = tpu.matmul %20, %21, %cst_11 {dimension_numbers = #tpu.dot_dimension_numbers<[1], [0], [0], [1], [0, 0, 1, 1], [], []>} : vector<16x256xbf16>, vector<256x128xbf16>, vector<16x128xf32> -> vector<16x128xf32>
    %c0_12 = arith.constant 0 : index
    %c0_13 = arith.constant 0 : index
    %23 = vector.load %arg5[%c0_12, %c0_13] : memref<1x128xf32, #tpu.memory_space<vmem>>, vector<1x128xf32>
    %24 = vector.broadcast %23 : vector<1x128xf32> to vector<16x128xf32>
    %25 = arith.addf %22, %24 : vector<16x128xf32>
    %c0_14 = arith.constant 0 : index
    %c0_15 = arith.constant 0 : index
    %26 = vector.load %arg6[%c0_14, %c0_15] : memref<16x128xf32, #tpu.memory_space<vmem>>, vector<16x128xf32>
    tpu.vector_store %arg6[%c0_14, %c0_15], %25 {strides = array<i32>} : memref<16x128xf32, #tpu.memory_space<vmem>>, vector<16x128xf32>,
    return
  }
  func.func @transform_0(%arg0: i32) -> (i32, i32) {
    %c0_i32 = arith.constant 0 : i32
    %c0_i32_0 = arith.constant 0 : i32
    return %arg0, %c0_i32 : i32, i32
  }
  func.func @transform_1(%arg0: i32) -> (i32, i32) {
    %c0_i32 = arith.constant 0 : i32
    %c0_i32_0 = arith.constant 0 : i32
    %c0_i32_1 = arith.constant 0 : i32
    return %c0_i32, %c0_i32_0 : i32, i32
  }
  func.func @transform_2(%arg0: i32) -> (i32, i32) {
    %c0_i32 = arith.constant 0 : i32
    %c0_i32_0 = arith.constant 0 : i32
    %c0_i32_1 = arith.constant 0 : i32
    return %c0_i32, %c0_i32_0 : i32, i32
  }
  func.func @transform_3(%arg0: i32) -> (i32, i32) {
    %c0_i32 = arith.constant 0 : i32
    %c0_i32_0 = arith.constant 0 : i32
    %c0_i32_1 = arith.constant 0 : i32
    return %c0_i32, %c0_i32_0 : i32, i32
  }
  func.func @transform_4(%arg0: i32) -> (i32, i32) {
    %c0_i32 = arith.constant 0 : i32
    %c0_i32_0 = arith.constant 0 : i32
    %c0_i32_1 = arith.constant 0 : i32
    return %c0_i32, %c0_i32_0 : i32, i32
  }
  func.func @transform_5(%arg0: i32) -> (i32, i32) {
    %c0_i32 = arith.constant 0 : i32
    %c0_i32_0 = arith.constant 0 : i32
    return %arg0, %c0_i32 : i32, i32
  }
}

</mosaic_0001>

<bundles_post_ra>
// kernel: tpu_custom_call.1
= control target key start
LH: loop header
LB: loop body
LE: loop exit
PB: predicated region body
PF: predicated region fallthrough
CT: control target
= control target key end

     0   :  { %10 = vsyncpa [#allocation3], 0  ;;  %s766_s0 = inlined_call_operand.hbm [shape: f32[16,128], index: 0, kind: input, shape index: {}]   ;;  %s767_s1 = inlined_call_operand.hbm [shape: bf16[128,256], index: 1, kind: input, shape index: {}]   ;;  %s768_s2 = inlined_call_operand.vmem [shape: f32[1,256], index: 2, kind: input, shape index: {}]   ;;  %s769_s3 = inlined_call_operand.hbm [shape: bf16[256,128], index: 3, kind: input, shape index: {}]   ;;  %s770_s4 = inlined_call_operand.vmem [shape: f32[1,128], index: 4, kind: input, shape index: {}]   ;;  %s771_s5 = inlined_call_operand.hbm [shape: f32[16,128], index: 5, kind: output, shape index: {}]  }
   0x1   :  { %11 = vsyncpa [#allocation6], 0 }
   0x2   :  { %12 = vsyncpa [#allocation4], 0  ;;  %s657_s18 = smov [#allocation5]   ;;  %s658_s20 = smov [#allocation2]  }
   0x3   :  { %s30_s19 = sshll.u32 %s657_s18, 4  ;;  %s18_s21 = sshll.u32 %s658_s20, 4  ;;  %s31_s19 = int_to_ptr.vmem [resolvable:$true] %s30_s19  ;;  %s696_s21 = int_to_ptr.vmem [resolvable:$true] %s18_s21 }
   0x4   :  { %s563_s24 = scalar_lea.hbm %s767_s1, 2048 }
   0x5   :  { %p564_p0 = scmp.ne.s32.totalorder %s767_s1, %s563_s24  ;;  %p567_p1 = scmp.lt.u32.totalorder %s563_s24, %s767_s1 }
   0x7   :  { %p569_p2 = pnand %p567_p1, %p564_p0 }
   0x9   :  { %572 = shalt.err (!%p569_p2)
}
   0xa   :  { %s573_s29 = scalar_lea.vmem %s31_s19, 2048  ;;  %p578_p4 = scmp.lt.s32.totalorder %s31_s19, %s31_s19 }
   0xb   :  { %p574_p3 = scmp.ne.s32.totalorder %s31_s19, %s573_s29  ;;  %p579_p5 = scmp.lt.s32.totalorder %s573_s29, %s573_s29 }
   0xd   :  { %p580_p6 = por %p579_p5, %p578_p4 }
   0xf   :  { %p581_p7 = pnand %p580_p6, %p574_p3 }
  0x11   :  { %584 = shalt.err (!%p581_p7)
}
  0x12   :  { %s659_s30 = smov 128   ;;  %s660_s6 = smov 8  }
  0x13   :  { %36 = dma.hbm_to_vmem [thread:$0]  %s767_s1, 2048, %s31_s19, [#allocation6], %s659_s30, %s659_s30, %s660_s6  }
  0x14   :  { %s585_s11 = scalar_lea.hbm %s766_s0, 256 }
  0x15   :  { %p586_p8 = scmp.ne.s32.totalorder %s766_s0, %s585_s11  ;;  %p589_p9 = scmp.lt.u32.totalorder %s585_s11, %s766_s0 }
  0x17   :  { %p591_p10 = pnand %p589_p9, %p586_p8 }
  0x19   :  { %594 = shalt.err (!%p591_p10)
}
  0x1a   :  { %s595_s16 = scalar_lea.vmem %s696_s21, 256  ;;  %p600_p12 = scmp.lt.s32.totalorder %s696_s21, %s696_s21 }
  0x1b   :  { %p596_p11 = scmp.ne.s32.totalorder %s696_s21, %s595_s16  ;;  %p601_p13 = scmp.lt.s32.totalorder %s595_s16, %s595_s16 }
  0x1d   :  { %p602_p0 = por %p601_p13, %p600_p12 }
  0x1f   :  { %p603_p1 = pnand %p602_p0, %p596_p11 }
  0x21   :  { %606 = shalt.err (!%p603_p1)
}
  0x22   :  { %24 = dma.hbm_to_vmem [thread:$0]  %s766_s0, 256, %s696_s21, [#allocation3], %s659_s30, %s659_s30, %s660_s6  }
  0x23   :  { %s661_s18 = smov [#allocation7]   ;;  %s607_s23 = scalar_lea.hbm %s769_s3, 2048 }
  0x24   :  { %s44_s19 = sshll.u32 %s661_s18, 4  ;;  %p608_p2 = scmp.ne.s32.totalorder %s769_s3, %s607_s23  ;;  %s45_s19 = int_to_ptr.vmem [resolvable:$true] %s44_s19 }
  0x25   :  { %p611_p3 = scmp.lt.u32.totalorder %s607_s23, %s769_s3 }
  0x27   :  { %p613_p4 = pnand %p611_p3, %p608_p2 }
  0x29   :  { %616 = shalt.err (!%p613_p4)
}
  0x2a   :  { %s617_s28 = scalar_lea.vmem %s45_s19, 2048  ;;  %p622_p6 = scmp.lt.s32.totalorder %s45_s19, %s45_s19 }
  0x2b   :  { %p618_p5 = scmp.ne.s32.totalorder %s45_s19, %s617_s28  ;;  %p623_p7 = scmp.lt.s32.totalorder %s617_s28, %s617_s28 }
  0x2d   :  { %p624_p8 = por %p623_p7, %p622_p6 }
  0x2f   :  { %p625_p9 = pnand %p624_p8, %p618_p5 }
  0x31   :  { %628 = shalt.err (!%p625_p9)
}
  0x32   :  { %s662_s0 = smov 64   ;;  %s663_s21 = smov 4  }
  0x33   :  { %50 = dma.hbm_to_vmem [thread:$0]  %s769_s3, 2048, %s45_s19, [#allocation6], %s662_s0, %s662_s0, %s663_s21  }
  0x34   :  { %651 = dma.done.wait [#allocation3], 256  }
  0x35   :  { %652 = vsyncadd [#allocation3], 4294967040 }
  0x36   :  { %653 = dma.done.wait [#allocation6], 4096  }
  0x37   :  { %654 = vsyncadd [#allocation6], 4294963200  ;;  %v664_v0 = vmov 0   ;;  %v515_v1 = vld [vmem:[#allocation5 + $0x4] ss:$8 sps:$4 sm:$0xff]   ;;  %v63_v17 = vld [vmem:[#allocation2] sm:$0xff]  ;;  %v84_v36 = vlaneseq }
  0x38   :  { %206 = vmatprep.mubr.bf16.mxu0 %v664_v0  ;;  %v517_v2 = vld [vmem:[#allocation5] ss:$8 sps:$4 sm:$0xff]   ;;  %174 = vmatprep.subr.bf16.mxu0 %v515_v1  ;;  %v518_v3 = vld [vmem:[#allocation5 + $0x14] ss:$8 sps:$4 sm:$0xff]   ;;  %v520_v4 = vld [vmem:[#allocation5 + $0x10] ss:$8 sps:$4 sm:$0xff]  }
  0x39   :  { %175 = vmatpush1.bf16.msra.mxu0 %v517_v2  ;;  %v521_v5 = vld [vmem:[#allocation5 + $0x24] ss:$8 sps:$4 sm:$0xff]   ;;  %v523_v6 = vld [vmem:[#allocation5 + $0x20] ss:$8 sps:$4 sm:$0xff]   ;;  %v524_v7 = vld [vmem:[#allocation5 + $0x34] ss:$8 sps:$4 sm:$0xff]  }
  0x3a   :  { %176 = vmatprep.subr.bf16.mxu0 %v518_v3  ;;  %v526_v8 = vld [vmem:[#allocation5 + $0x30] ss:$8 sps:$4 sm:$0xff]   ;;  %v527_v9 = vld [vmem:[#allocation5 + $0x44] ss:$8 sps:$4 sm:$0xff]   ;;  %v529_v10 = vld [vmem:[#allocation5 + $0x40] ss:$8 sps:$4 sm:$0xff]  }
  0x3b   :  { %v530_v11 = vld [vmem:[#allocation5 + $0x54] ss:$8 sps:$4 sm:$0xff]   ;;  %v532_v12 = vld [vmem:[#allocation5 + $0x50] ss:$8 sps:$4 sm:$0xff]   ;;  %v533_v13 = vld [vmem:[#allocation5 + $0x64] ss:$8 sps:$4 sm:$0xff]  }
  0x3c   :  { %v535_v14 = vld [vmem:[#allocation5 + $0x60] ss:$8 sps:$4 sm:$0xff]   ;;  %v536_v15 = vld [vmem:[#allocation5 + $0x74] ss:$8 sps:$4 sm:$0xff]   ;;  %v538_v16 = vld [vmem:[#allocation5 + $0x70] ss:$8 sps:$4 sm:$0xff]  }
  0x3d   :  { %177 = vmatpush1.bf16.msra.mxu0 %v520_v4  ;;  %v64_v18 = vld [vmem:[#allocation2 + $0x8] sm:$0xff]  ;;  %v539_v20 = vld [vmem:[#allocation7 + $0x40] sm:$0xff]   ;;  %v541_v22 = vld [vmem:[#allocation7 + $0x48] sm:$0xff]   ;;  %v85_v37 = vshrl.u32 %v84_v36, 7  ;;  %s665_s10 = smov [#allocation8]  }
  0x3e   :  { %178 = vmatprep.subr.bf16.mxu0 %v521_v5  ;;  %v65_v19 = vpack.c.bf16 %v64_v18, %v63_v17  ;;  %v540_v21 = vld [vmem:[#allocation7] sm:$0xff]   ;;  %484 = vmatprep.subr.bf16.mxu1 %v539_v20  ;;  %v542_v23 = vld [vmem:[#allocation7 + $0x8] sm:$0xff]   ;;  %v543_v24 = vld [vmem:[#allocation7 + $0x50] sm:$0xff]   ;;  %s438_s11 = sshll.u32 %s665_s10, 4  ;;  %s439_s11 = int_to_ptr.vmem [resolvable:$true] %s438_s11 }
  0x3f   :  { %485 = vmatpush3.bf16.msra.mxu1 %v540_v21  ;;  %v544_v25 = vld [vmem:[#allocation7 + $0x10] sm:$0xff]   ;;  %v545_v26 = vld [vmem:[#allocation7 + $0x58] sm:$0xff]   ;;  %v547_v28 = vld [vmem:[#allocation7 + $0x60] sm:$0xff]   ;;  %v86_v38 = vsub.s32 0, %v85_v37  ;;  %v90_v40 = vsub.s32 1, %v85_v37  ;;  %s629_s12 = scalar_lea.vmem %s439_s11, 256  ;;  %p634_p11 = scmp.lt.s32.totalorder %s439_s11, %s439_s11 }
  0x40   :  { %486 = vmatprep.subr.bf16.mxu1 %v541_v22  ;;  %v546_v27 = vld [vmem:[#allocation7 + $0x18] sm:$0xff]   ;;  %v548_v29 = vld [vmem:[#allocation7 + $0x20] sm:$0xff]   ;;  %v549_v30 = vld [vmem:[#allocation7 + $0x68] sm:$0xff]   ;;  %p630_p10 = scmp.ne.s32.totalorder %s439_s11, %s629_s12  ;;  %p635_p12 = scmp.lt.s32.totalorder %s629_s12, %s629_s12 }
  0x41   :  { %179 = vmatpush1.bf16.msra.mxu0 %v523_v6  ;;  %v550_v31 = vld [vmem:[#allocation7 + $0x28] sm:$0xff]   ;;  %v551_v32 = vld [vmem:[#allocation7 + $0x70] sm:$0xff]   ;;  %v553_v34 = vld [vmem:[#allocation7 + $0x78] sm:$0xff]  }
  0x42   :  { %180 = vmatprep.subr.bf16.mxu0 %v524_v7  ;;  %v552_v33 = vld [vmem:[#allocation7 + $0x30] sm:$0xff]   ;;  %v554_v35 = vld [vmem:[#allocation7 + $0x38] sm:$0xff]   ;;  %p636_p13 = por %p635_p12, %p634_p11 }
  0x43   :  { %487 = vmatpush3.bf16.msra.mxu1 %v542_v23  ;;  %v82_v39 = vld [vmem:[%s768_s2] sm:$0x3] }
  0x44   :  { %488 = vmatprep.subr.bf16.mxu1 %v543_v24  ;;  %v87_v41 = vrot.slane %v82_v39, %v86_v38  ;;  %v91_v42 = vrot.slane %v82_v39, %v90_v40  ;;  %p637_p0 = pnand %p636_p13, %p630_p10 }
  0x45   :  { %181 = vmatpush1.bf16.msra.mxu0 %v526_v8 }
  0x46   :  { %182 = vmatprep.subr.bf16.mxu0 %v527_v9 }
  0x47   :  { %489 = vmatpush3.bf16.msra.mxu1 %v544_v25 }
  0x48   :  { %490 = vmatprep.subr.bf16.mxu1 %v545_v26  ;;  %v467_v26 = vld [vmem:[%s770_s4] ss:$0 sm:$0xff] }
  0x49   :  { %183 = vmatpush1.bf16.msra.mxu0 %v529_v10 }
  0x4a   :  { %184 = vmatprep.subr.bf16.mxu0 %v530_v11 }
  0x4b   :  { %491 = vmatpush3.bf16.msra.mxu1 %v546_v27 }
  0x4c   :  { %492 = vmatprep.subr.bf16.mxu1 %v547_v28 }
  0x4d   :  { %185 = vmatpush1.bf16.msra.mxu0 %v532_v12 }
  0x4e   :  { %186 = vmatprep.subr.bf16.mxu0 %v533_v13 }
  0x4f   :  { %493 = vmatpush3.bf16.msra.mxu1 %v548_v29 }
  0x50   :  { %494 = vmatprep.subr.bf16.mxu1 %v549_v30 }
  0x51   :  { %187 = vmatpush1.bf16.msra.mxu0 %v535_v14 }
  0x52   :  { %188 = vmatprep.subr.bf16.mxu0 %v536_v15 }
  0x53   :  { %495 = vmatpush3.bf16.msra.mxu1 %v550_v31 }
  0x54   :  { %496 = vmatprep.subr.bf16.mxu1 %v551_v32 }
  0x55   :  { %189 = vmatpush1.bf16.msra.mxu0 %v538_v16 }
  0x57   :  { %497 = vmatpush3.bf16.msra.mxu1 %v552_v33 }
  0x58   :  { %207 = vmatmul.mubr.bf16.vlgmr.msra.gmra.mrb[0].mxu0 %v65_v19  ;;  %498 = vmatprep.subr.bf16.mxu1 %v553_v34 }
  0x5b   :  { %499 = vmatpush3.bf16.msra.mxu1 %v554_v35 }
 0x12b   :  { %v208_v43 = vpop.f32.mrb[0].mxu0 }
 0x12c   :  { %v209_v44 = vadd.f32 %v208_v43, %v87_v41  ;;  %v210_v45 = vpop.f32.mrb[1].mxu0 }
 0x12d   :  { %v211_v46 = vadd.f32 %v210_v45, %v91_v42  ;;  %v212_v47 = vpop.f32.mrb[2].mxu0 }
 0x12e   :  { %v221_v48 = vmul.f32 0.044715, %v209_v44  ;;  %v213_v49 = vadd.f32 %v212_v47, %v87_v41  ;;  %v214_v50 = vpop.f32.mrb[3].mxu0  ;;  %v217_v13 = vmul.f32 0.5, %v209_v44 }
 0x12f   :  { %v222_v51 = vmul.f32 0.044715, %v211_v46  ;;  %v215_v52 = vadd.f32 %v214_v50, %v91_v42  ;;  %v218_v16 = vmul.f32 0.5, %v211_v46 }
 0x130   :  { %v225_v53 = vmul.f32 %v221_v48, %v209_v44  ;;  %v223_v54 = vmul.f32 0.044715, %v213_v49  ;;  %v219_v14 = vmul.f32 0.5, %v213_v49 }
 0x131   :  { %v224_v55 = vmul.f32 0.044715, %v215_v52  ;;  %v226_v56 = vmul.f32 %v222_v51, %v211_v46  ;;  %v220_v17 = vmul.f32 0.5, %v215_v52 }
 0x132   :  { %v229_v57 = vmul.f32 %v225_v53, %v209_v44  ;;  %v227_v58 = vmul.f32 %v223_v54, %v213_v49 }
 0x133   :  { %v228_v59 = vmul.f32 %v224_v55, %v215_v52  ;;  %v230_v60 = vmul.f32 %v226_v56, %v211_v46 }
 0x134   :  { %v231_v61 = vmul.f32 %v227_v58, %v213_v49  ;;  %v233_v62 = vadd.f32 %v229_v57, %v209_v44 }
 0x135   :  { %v232_v63 = vmul.f32 %v228_v59, %v215_v52  ;;  %v234_v0 = vadd.f32 %v230_v60, %v211_v46 }
 0x136   :  { %v235_v1 = vadd.f32 %v231_v61, %v213_v49  ;;  %v237_v2 = vmul.f32 0.7978846, %v233_v62 }
 0x137   :  { %v236_v3 = vadd.f32 %v232_v63, %v215_v52  ;;  %v238_v4 = vmul.f32 0.7978846, %v234_v0 }
 0x138   :  { %v239_v5 = vmul.f32 0.7978846, %v235_v1  ;;  %555 = vtanh.f32 %v237_v2 }
 0x139   :  { %v240_v6 = vmul.f32 0.7978846, %v236_v3  ;;  %557 = vtanh.f32 %v238_v4 }
 0x13a   :  { %559 = vtanh.f32 %v239_v5 }
 0x13b   :  { %561 = vtanh.f32 %v240_v6 }
 0x142   :  { %v556_v7 = vpop.eup %555 }
 0x143   :  { %v558_v8 = vpop.eup %557  ;;  %v245_v9 = vadd.f32 1.0, %v556_v7 }
 0x144   :  { %v560_v10 = vpop.eup %559  ;;  %v246_v11 = vadd.f32 1.0, %v558_v8 }
 0x145   :  { %v562_v12 = vpop.eup %561  ;;  %v247_v15 = vadd.f32 1.0, %v560_v10  ;;  %v249_v19 = vmul.f32 %v245_v9, %v217_v13 }
 0x146   :  { %v248_v18 = vadd.f32 1.0, %v562_v12  ;;  %v250_v21 = vmul.f32 %v246_v11, %v218_v16 }
 0x147   :  { %v251_v20 = vmul.f32 %v247_v15, %v219_v14 }
 0x148   :  { %v252_v22 = vmul.f32 %v248_v18, %v220_v17 }
 0x149   :  { %v253_v23 = vpack.c.bf16 %v251_v20, %v249_v19 }
 0x14a   :  { %v254_v24 = vpack.c.bf16 %v252_v22, %v250_v21 }
 0x14c   :  { %422 = vmatprep.mubr.bf16.mxu1 %v254_v24 }
 0x14d   :  { %423 = vmatmul.mubr.bf16.vlgmr.msra.gmra.mrb[0].mxu1 %v253_v23 }
 0x220   :  { %v500_v25 = vpop.f32.mrb[0].mxu1 }
 0x221   :  { %v501_v27 = vpop.f32.mrb[1].mxu1 }
 0x222   :  { %v502_v28 = vadd.f32 %v501_v27, %v500_v25  ;;  %v503_v29 = vpop.f32.mrb[2].mxu1 }
 0x223   :  { %v504_v30 = vpop.f32.mrb[3].mxu1 }
 0x224   :  { %v425_v31 = vadd.f32 %v502_v28, %v467_v26  ;;  %v505_v32 = vadd.f32 %v504_v30, %v503_v29 }
 0x226   :  { %431 = vst [vmem:[#allocation8] sm:$0xff] %v425_v31  ;;  %v428_v33 = vadd.f32 %v505_v32, %v467_v26 }
 0x228   :  { %432 = vst [vmem:[#allocation8 + $0x8] sm:$0xff] %v428_v33 }
 0x229   :  { %640 = shalt.err (!%p637_p0)
}
 0x22a   :  { %s641_s14 = scalar_lea.hbm %s771_s5, 256 }
 0x22b   :  { %p642_p1 = scmp.ne.s32.totalorder %s771_s5, %s641_s14  ;;  %p645_p2 = scmp.lt.u32.totalorder %s641_s14, %s771_s5 }
 0x22d   :  { %p647_p3 = pnand %p645_p2, %p642_p1 }
 0x22f   :  { %650 = shalt.err (!%p647_p3)
}
 0x230   :  { %444 = dma.vmem_to_hbm [thread:$0]  %s439_s11, 256, %s771_s5, [#allocation4], %s659_s30, %s659_s30, %s660_s6  }
 0x231   :  { %655 = dma.done.wait [#allocation4], 256  }
 0x232   :  { %656 = vsyncadd [#allocation4], 4294967040 }
 0x233   :  { %448 = vsyncpa [#allocation3], 1 }
 0x234   :  { %449 = vsyncpa [#allocation6], 1 }
 0x235   :  { %450 = vsyncpa [#allocation4], 1 }

</bundles_post_ra>
